<compile_context>
chip_gen: v6e
topology: v6e:2x2x1
jax: 0.10.0
libtpu: 0.0.40
codegen_flags: <defaults>
</compile_context>

<pallas_src>
import functools
import math

import jax
import jax.numpy as jnp
from jax import lax
from jax.experimental import pallas as pl
from jax.experimental.pallas import tpu as pltpu


def _round_up(x, m):
    return (x + m - 1) // m * m


def _kl_dirac_vmf_kernel(mu_ref, wc_ref, kappa_ref, coef_ref, logc_ref,
                         out_ref, *, d, radius):
    mu = mu_ref[...]          # (tb, d)  batch on sublanes, features on lanes
    wc = wc_ref[...]          # (tb, d)
    kappa = kappa_ref[...]    # (1, tb)  batch on lanes (lane-dense)
    coef = coef_ref[...]      # (K, 1)   nu + 2k              (host precomputed)
    logc = logc_ref[...]      # (K, 1)  -lgamma(k+1)-lgamma(nu+k+1)

    # Row-wise dot(mu, wc), produced lane-dense via the MXU (rhs-transposed
    # matmul).  HIGHEST precision keeps f32 accuracy for the reduction.
    prod = mu * wc                                             # (tb, d)
    ones_row = jnp.ones((1, prod.shape[1]), jnp.float32)
    cos_theta = lax.dot_general(
        ones_row, prod,
        dimension_numbers=(((1,), (1,)), ((), ())),
        precision=lax.Precision.HIGHEST,
        preferred_element_type=jnp.float32) / radius           # (1, tb)

    # ive(nu, kappa): log-domain truncated series; every term <= ive <= 1 so
    # exp never overflows.  K on sublanes, batch on lanes -> sublane reduce.
    log_half_kappa = jnp.log(0.5 * jnp.maximum(kappa, 1e-30))  # (1, tb)
    exponents = coef * log_half_kappa + logc - kappa           # (K, tb)
    ive = jnp.sum(jnp.exp(exponents), axis=0, keepdims=True)   # (1, tb)

    log_iv_kappa = jnp.log(1e-6 + ive) + kappa                 # log I_nu(kappa)

    l1 = -kappa * cos_theta
    l2 = -(d / 2.0 - 1.0) * jnp.log(1e-6 + kappa)
    l3 = log_iv_kappa * 1.0
    const = d / 2.0 * math.log(2.0 * math.pi) + d * math.log(radius)
    losses = l1 + l2 + l3 + const

    # One packed, lane-dense (4, tb) store per grid step.
    out_ref[...] = jnp.concatenate([losses, l1, l2, l3], axis=0)


def _choose_tile(B, block_b):
    """Pick the batch tile (lane width of the per-step blocks).

    - small B: single full block, no padding (block == full array dims).
    - large B: big tile (multiple of 128 for lane-dense blocks), at least 2
      grid steps so both TensorCores get work on v7x megacore.
    """
    if B <= 256:
        return B, B
    tb = min(block_b, _round_up(pl.cdiv(B, 2), 128))
    bp = _round_up(B, tb)
    return tb, bp


def kl_dirac_vmf(mu, kappa, wc, *, z_dim, radius, num_terms=64, block_b=1024):
    B, d = mu.shape
    assert d == z_dim
    assert kappa.shape == (B, 1) and wc.shape == (B, d)
    assert num_terms % 8 == 0  # sublane-aligned series block

    mu = mu.astype(jnp.float32)
    wc = wc.astype(jnp.float32)
    kappa_row = kappa.astype(jnp.float32).reshape(1, B)   # batch on lanes

    nu = d / 2.0 - 1.0
    # Static series coefficients (depend only on nu, k), computed on host.
    coef = jnp.asarray([[nu + 2.0 * k] for k in range(num_terms)],
                       dtype=jnp.float32)                               # (K, 1)
    logc = jnp.asarray([[-math.lgamma(k + 1.0) - math.lgamma(nu + k + 1.0)]
                        for k in range(num_terms)], dtype=jnp.float32)  # (K, 1)

    tb, bp = _choose_tile(B, block_b)
    if bp != B:
        pad = bp - B
        mu_p = jnp.pad(mu, ((0, pad), (0, 0)))
        wc_p = jnp.pad(wc, ((0, pad), (0, 0)))
        # Pad kappa with 1.0 so log() in the padded lanes stays finite.
        kappa_p = jnp.pad(kappa_row, ((0, 0), (0, pad)), constant_values=1.0)
    else:
        mu_p, wc_p, kappa_p = mu, wc, kappa_row

    grid = (bp // tb,)
    kernel = functools.partial(_kl_dirac_vmf_kernel,
                               d=float(d), radius=float(radius))

    out = pl.pallas_call(
        kernel,
        out_shape=jax.ShapeDtypeStruct((4, bp), jnp.float32),
        grid_spec=pltpu.PrefetchScalarGridSpec(
            num_scalar_prefetch=0,
            grid=grid,
            in_specs=[
                pl.BlockSpec((tb, d), lambda i: (i, 0)),           # mu
                pl.BlockSpec((tb, d), lambda i: (i, 0)),           # wc
                pl.BlockSpec((1, tb), lambda i: (0, i)),           # kappa (lanes)
                pl.BlockSpec((num_terms, 1), lambda i: (0, 0)),    # coef (shared)
                pl.BlockSpec((num_terms, 1), lambda i: (0, 0)),    # logc (shared)
            ],
            out_specs=pl.BlockSpec((4, tb), lambda i: (0, i)),     # packed outs
        ),
        compiler_params=pltpu.CompilerParams(
            dimension_semantics=("parallel",)),
    )(mu_p, wc_p, kappa_p, coef, logc)

    out = out[:, :B]
    losses = out[0].reshape(B, 1)
    l1 = out[1].reshape(B, 1)
    l2 = out[2].reshape(B, 1)
    l3 = out[3].reshape(B, 1)
    return losses, l1, l2, l3


def _reference(mu, kappa, wc, *, z_dim, radius, num_terms=64):
    """Plain-JAX reference of the same forward (same truncated series)."""
    d = float(z_dim)
    nu = d / 2.0 - 1.0
    logc = jnp.asarray(
        [[-math.lgamma(k + 1.0) - math.lgamma(nu + k + 1.0)
          for k in range(num_terms)]], dtype=jnp.float32)             # (1, K)
    k_idx = jnp.arange(num_terms, dtype=jnp.float32)[None, :]
    log_half_kappa = jnp.log(0.5 * jnp.maximum(kappa, 1e-30))          # (B, 1)
    exponents = (nu + 2.0 * k_idx) * log_half_kappa + logc - kappa     # (B, K)
    ive = jnp.sum(jnp.exp(exponents), axis=1, keepdims=True)           # (B, 1)
    log_iv_kappa = jnp.log(1e-6 + ive) + kappa
    cos_theta = jnp.sum(mu * wc, axis=1, keepdims=True) / radius
    l1 = -kappa * cos_theta
    l2 = -(d / 2.0 - 1.0) * jnp.log(1e-6 + kappa)
    l3 = log_iv_kappa * 1.0
    losses = (l1 + l2 + l3
              + d / 2.0 * math.log(2.0 * math.pi) + d * math.log(radius))
    return losses, l1, l2, l3


if __name__ == "__main__":
    def run_case(B, z_dim, radius, seed):
        key = jax.random.PRNGKey(seed)
        k1, k2, k3 = jax.random.split(key, 3)
        mu = jax.random.normal(k1, (B, z_dim), dtype=jnp.float32)
        mu = radius * mu / jnp.linalg.norm(mu, axis=1, keepdims=True)
        wc = jax.random.normal(k2, (B, z_dim), dtype=jnp.float32)
        wc = radius * wc / jnp.linalg.norm(wc, axis=1, keepdims=True)
        kappa = jax.random.uniform(k3, (B, 1), dtype=jnp.float32,
                                   minval=1.0, maxval=20.0)

        outs = jax.block_until_ready(
            kl_dirac_vmf(mu, kappa, wc, z_dim=z_dim, radius=radius))
        refs = _reference(mu, kappa, wc, z_dim=z_dim, radius=radius)
        for got, ref in zip(outs, refs):
            assert got.shape == (B, 1)
            assert jnp.allclose(got, ref, rtol=1e-3, atol=1e-3), (B, got, ref)

    run_case(8, 32, 1.0, 0)     # small-batch path: single block, tb = B
    run_case(300, 32, 1.0, 0)   # tiled path: tb = 256, grid = 2, padded batch
    print("KERNEL_OK")
</pallas_src>

<mosaic_0001>
module attributes {stable_mosaic.version = 11 : i64} {
  func.func @_kl_dirac_vmf_kernel(%arg0: i32, %arg1: memref<8x32xf32, #tpu.memory_space<vmem>>, %arg2: memref<8x32xf32, #tpu.memory_space<vmem>>, %arg3: memref<1x8xf32, #tpu.memory_space<vmem>>, %arg4: memref<64x1xf32, #tpu.memory_space<vmem>>, %arg5: memref<64x1xf32, #tpu.memory_space<vmem>>, %arg6: memref<4x8xf32, #tpu.memory_space<vmem>>) attributes {dimension_semantics = [#tpu.dimension_semantics<parallel>], iteration_bounds = array<i64: 1>, scalar_prefetch = 0 : i64, scratch_operands = 0 : i64, tpu.core_type = #tpu.core_type<tc>, window_params = [{transform_indices = @transform_0, window_bounds = array<i64: 8, 32>}, {transform_indices = @transform_1, window_bounds = array<i64: 8, 32>}, {transform_indices = @transform_2, window_bounds = array<i64: 1, 8>}, {pipeline_mode = #tpu.pipeline_mode<synchronous>, transform_indices = @transform_3, window_bounds = array<i64: 64, 1>}, {pipeline_mode = #tpu.pipeline_mode<synchronous>, transform_indices = @transform_4, window_bounds = array<i64: 64, 1>}, {transform_indices = @transform_5, window_bounds = array<i64: 4, 8>}]} {
    %c0 = arith.constant 0 : index
    %c0_0 = arith.constant 0 : index
    %0 = vector.load %arg1[%c0, %c0_0] : memref<8x32xf32, #tpu.memory_space<vmem>>, vector<8x32xf32>
    %c0_1 = arith.constant 0 : index
    %c0_2 = arith.constant 0 : index
    %1 = vector.load %arg2[%c0_1, %c0_2] : memref<8x32xf32, #tpu.memory_space<vmem>>, vector<8x32xf32>
    %c0_3 = arith.constant 0 : index
    %c0_4 = arith.constant 0 : index
    %2 = vector.load %arg3[%c0_3, %c0_4] : memref<1x8xf32, #tpu.memory_space<vmem>>, vector<1x8xf32>
    %c0_5 = arith.constant 0 : index
    %c0_6 = arith.constant 0 : index
    %3 = vector.load %arg4[%c0_5, %c0_6] : memref<64x1xf32, #tpu.memory_space<vmem>>, vector<64x1xf32>
    %c0_7 = arith.constant 0 : index
    %c0_8 = arith.constant 0 : index
    %4 = vector.load %arg5[%c0_7, %c0_8] : memref<64x1xf32, #tpu.memory_space<vmem>>, vector<64x1xf32>
    %5 = arith.mulf %0, %1 : vector<8x32xf32>
    %cst = arith.constant 1.000000e+00 : f32
    %6 = vector.broadcast %cst : f32 to vector<1x32xf32>
    %cst_9 = arith.constant dense<0.000000e+00> : vector<1x8xf32>
    %7 = tpu.matmul %6, %5, %cst_9 {dimension_numbers = #tpu.dot_dimension_numbers<[1], [1], [0], [0], [0, 0, 1, 0], [], []>, precision = #tpu.contract_precision<fp32>} : vector<1x32xf32>, vector<8x32xf32>, vector<1x8xf32> -> vector<1x8xf32>
    %cst_10 = arith.constant 1.000000e+00 : f32
    %8 = vector.broadcast %cst_10 : f32 to vector<1x8xf32>
    %9 = arith.divf %7, %8 : vector<1x8xf32>
    %cst_11 = arith.constant 1.000000e-30 : f32
    %10 = vector.broadcast %cst_11 : f32 to vector<1x8xf32>
    %11 = arith.maximumf %2, %10 : vector<1x8xf32>
    %cst_12 = arith.constant 5.000000e-01 : f32
    %12 = vector.broadcast %cst_12 : f32 to vector<1x8xf32>
    %13 = arith.mulf %12, %11 : vector<1x8xf32>
    %14 = math.log %13 : vector<1x8xf32>
    %15 = vector.broadcast %3 : vector<64x1xf32> to vector<64x8xf32>
    %16 = vector.broadcast %14 : vector<1x8xf32> to vector<64x8xf32>
    %17 = arith.mulf %15, %16 : vector<64x8xf32>
    %18 = vector.broadcast %4 : vector<64x1xf32> to vector<64x8xf32>
    %19 = arith.addf %17, %18 : vector<64x8xf32>
    %20 = vector.broadcast %2 : vector<1x8xf32> to vector<64x8xf32>
    %21 = arith.subf %19, %20 : vector<64x8xf32>
    %22 = math.exp %21 : vector<64x8xf32>
    %cst_13 = arith.constant dense<0.000000e+00> : vector<8xf32>
    %23 = vector.multi_reduction <add>, %22, %cst_13 [0] : vector<64x8xf32> to vector<8xf32>
    %24 = vector.shape_cast %23 : vector<8xf32> to vector<1x8xf32>
    %cst_14 = arith.constant 9.99999997E-7 : f32
    %25 = vector.broadcast %cst_14 : f32 to vector<1x8xf32>
    %26 = arith.addf %25, %24 : vector<1x8xf32>
    %27 = math.log %26 : vector<1x8xf32>
    %28 = arith.addf %27, %2 : vector<1x8xf32>
    %cst_15 = arith.constant 0.000000e+00 : f32
    %29 = vector.broadcast %cst_15 : f32 to vector<1x8xf32>
    %30 = arith.subf %29, %2 : vector<1x8xf32>
    %31 = arith.mulf %30, %9 : vector<1x8xf32>
    %cst_16 = arith.constant 9.99999997E-7 : f32
    %32 = vector.broadcast %cst_16 : f32 to vector<1x8xf32>
    %33 = arith.addf %32, %2 : vector<1x8xf32>
    %34 = math.log %33 : vector<1x8xf32>
    %cst_17 = arith.constant -1.500000e+01 : f32
    %35 = vector.broadcast %cst_17 : f32 to vector<1x8xf32>
    %36 = arith.mulf %35, %34 : vector<1x8xf32>
    %cst_18 = arith.constant 1.000000e+00 : f32
    %37 = vector.broadcast %cst_18 : f32 to vector<1x8xf32>
    %38 = arith.mulf %28, %37 : vector<1x8xf32>
    %39 = arith.addf %31, %36 : vector<1x8xf32>
    %40 = arith.addf %39, %38 : vector<1x8xf32>
    %cst_19 = arith.constant 29.4060326 : f32
    %41 = vector.broadcast %cst_19 : f32 to vector<1x8xf32>
    %42 = arith.addf %40, %41 : vector<1x8xf32>
    %43 = tpu.concatenate %42, %31, %36, %38 in 0 : vector<1x8xf32>, vector<1x8xf32>, vector<1x8xf32>, vector<1x8xf32> -> vector<4x8xf32>
    %c0_20 = arith.constant 0 : index
    %c0_21 = arith.constant 0 : index
    %44 = vector.load %arg6[%c0_20, %c0_21] : memref<4x8xf32, #tpu.memory_space<vmem>>, vector<4x8xf32>
    tpu.vector_store %arg6[%c0_20, %c0_21], %43 {strides = array<i32>} : memref<4x8xf32, #tpu.memory_space<vmem>>, vector<4x8xf32>,
    return
  }
  func.func @transform_0(%arg0: i32) -> (i32, i32) {
    %c0_i32 = arith.constant 0 : i32
    %c0_i32_0 = arith.constant 0 : i32
    return %arg0, %c0_i32 : i32, i32
  }
  func.func @transform_1(%arg0: i32) -> (i32, i32) {
    %c0_i32 = arith.constant 0 : i32
    %c0_i32_0 = arith.constant 0 : i32
    return %arg0, %c0_i32 : i32, i32
  }
  func.func @transform_2(%arg0: i32) -> (i32, i32) {
    %c0_i32 = arith.constant 0 : i32
    %c0_i32_0 = arith.constant 0 : i32
    return %c0_i32, %arg0 : i32, i32
  }
  func.func @transform_3(%arg0: i32) -> (i32, i32) {
    %c0_i32 = arith.constant 0 : i32
    %c0_i32_0 = arith.constant 0 : i32
    %c0_i32_1 = arith.constant 0 : i32
    return %c0_i32, %c0_i32_0 : i32, i32
  }
  func.func @transform_4(%arg0: i32) -> (i32, i32) {
    %c0_i32 = arith.constant 0 : i32
    %c0_i32_0 = arith.constant 0 : i32
    %c0_i32_1 = arith.constant 0 : i32
    return %c0_i32, %c0_i32_0 : i32, i32
  }
  func.func @transform_5(%arg0: i32) -> (i32, i32) {
    %c0_i32 = arith.constant 0 : i32
    %c0_i32_0 = arith.constant 0 : i32
    return %c0_i32, %arg0 : i32, i32
  }
}

</mosaic_0001>

<bundles_post_ra>
// kernel: tpu_custom_call.1
= control target key start
LH: loop header
LB: loop body
LE: loop exit
PB: predicated region body
PF: predicated region fallthrough
CT: control target
= control target key end

     0   :  { %vm41_vm0 = vcmask 261120   ;;  %v798_v2 = vmov 0   ;;  %v799_v9 = vmov 0.0   ;;  %vm800_vm1 = vmmov 0   ;;  %s925_s0 = inlined_call_operand.vmem [shape: f32[8,32], index: 0, kind: input, shape index: {}]   ;;  %s926_s1 = inlined_call_operand.vmem [shape: f32[8,32], index: 1, kind: input, shape index: {}]   ;;  %s927_s2 = inlined_call_operand.vmem [shape: f32[1,8], index: 2, kind: input, shape index: {}]   ;;  %s928_s3 = inlined_call_operand.vmem [shape: f32[64,1], index: 3, kind: input, shape index: {}]   ;;  %s929_s4 = inlined_call_operand.vmem [shape: f32[64,1], index: 4, kind: input, shape index: {}]   ;;  %s930_s5 = inlined_call_operand.hbm [shape: f32[4,8], index: 5, kind: output, shape index: {}]  }
   0x1   :  { %v26_v0 = vld [vmem:[%s928_s3 + $0x10] sm:$0xff]  ;;  %v24_v1 = vld [vmem:[%s928_s3] sm:$0xff]  ;;  %753 = vset.pattern.permute.xlu1 %v798_v2  ;;  %v43_v3 = vsel %vm41_vm0, 1.0, %v798_v2  ;;  %752 = vset.pattern.permute.xlu0 %v798_v2  ;;  %v25_v8 = vld [vmem:[%s928_s3 + $0x8] sm:$0xff] }
   0x2   :  { %v115_v4 = vsub.f32 %v43_v3, %v43_v3  ;;  %510 = vperm.xlu1 %753, %v26_v0   ;;  %500 = vperm.xlu0 %752, %v24_v1   ;;  %v21_v5 = vld [vmem:[%s925_s0] sm:$0xff] }
   0x3   :  { %v22_v6 = vld [vmem:[%s926_s1] sm:$0xff]  ;;  %717 = vmatprep.subr.mxu0 %v799_v9  ;;  %719 = vmatprep.mubr.msk.f32.mxu0 %vm800_vm1, %v799_v9 }
   0x4   :  { %v32_v7 = vld [vmem:[%s929_s4] sm:$0xff]  ;;  %v40_v10 = vmul.f32 %v22_v6, %v21_v5  ;;  %722 = vmatprep.subr.mxu1 %v799_v9  ;;  %v116_v11 = vand.u32 4294901760, %v115_v4  ;;  %724 = vmatprep.mubr.msk.f32.mxu1 %vm800_vm1, %v799_v9 }
   0x6   :  { %v46_v12 = vsel %vm41_vm0, %v40_v10, 0  ;;  %554 = vperm.xlu1 %753, %v32_v7   ;;  %505 = vperm.xlu0 %752, %v25_v8   ;;  %v117_v14 = vsub.f32 %v115_v4, %v116_v11 }
   0x7   :  { %v79_v13 = vand.u32 4294901760, %v46_v12 }
   0x8   :  { %10 = vsyncpa [#allocation3], 0  ;;  %v27_v15 = vld [vmem:[%s928_s3 + $0x18] sm:$0xff]  ;;  %v33_v16 = vld [vmem:[%s929_s4 + $0x8] sm:$0xff]  ;;  %v118_v17 = vand.u32 4294901760, %v117_v14  ;;  %v801_v26 = vmov 1.0   ;;  %v539_v36 = vlaneseq }
   0x9   :  { %718 = vmatpush3.xpose.msra.mxu0 %v79_v13  ;;  %v156_v18 = vsub.f32 %v46_v12, %v79_v13  ;;  %v28_v20 = vld [vmem:[%s928_s3 + $0x20] sm:$0xff]  ;;  %v34_v21 = vld [vmem:[%s929_s4 + $0x10] sm:$0xff]  ;;  %v29_v24 = vld [vmem:[%s928_s3 + $0x28] sm:$0xff]  ;;  %vm630_vm2 = vcmask 64512   ;;  %vm680_vm3 = vcmask 1040384   ;;  %vm682_vm4 = vcmask 1041408  }
   0xa   :  { %727 = vmatprep.subr.mxu0 %v799_v9  ;;  %515 = vperm.xlu1 %753, %v27_v15   ;;  %v35_v25 = vld [vmem:[%s929_s4 + $0x18] sm:$0xff]  ;;  %v30_v27 = vld [vmem:[%s928_s3 + $0x30] sm:$0xff]  ;;  %v36_v28 = vld [vmem:[%s929_s4 + $0x20] sm:$0xff]  ;;  %v540_v37 = vshrl.u32 %v539_v36, 7  ;;  %vm684_vm5 = vcmask 1042432   ;;  %vm686_vm6 = vcmask 60416  }
   0xb   :  { %559 = vperm.xlu0 %752, %v33_v16   ;;  %v157_v19 = vand.u32 4294901760, %v156_v18  ;;  %v31_v29 = vld [vmem:[%s928_s3 + $0x38] sm:$0xff]  ;;  %v37_v30 = vld [vmem:[%s929_s4 + $0x28] sm:$0xff]  ;;  %v38_v32 = vld [vmem:[%s929_s4 + $0x30] sm:$0xff] }
   0xc   :  { %720 = vmatmul.mubr.f32.vlgmr.msra.gmra.mxu0 %v118_v17  ;;  %v39_v31 = vld [vmem:[%s929_s4 + $0x38] sm:$0xff]  ;;  %v901_v33 = vld [vmem:[%s927_s2] sm:$0x1]  ;;  %v904_v39 = vsub.s32 0, %v540_v37  ;;  %s802_s2 = smov [#allocation2]  }
   0xd   :  { %v158_v22 = vsub.f32 %v156_v18, %v157_v19  ;;  %728 = vmatpush3.xpose.msra.mxu0 %v156_v18  ;;  %729 = vmatprep.mubr.msk.f32.mxu0 %vm800_vm1, %v799_v9  ;;  %v494_v34 = vmax.f32 %v901_v33, 1e-30  ;;  %s694_s4 = sshll.u32 %s802_s2, 4  ;;  %s695_s4 = int_to_ptr.vmem [resolvable:$true] %s694_s4 }
   0xe   :  { %737 = vmatprep.subr.mxu0 %v799_v9  ;;  %520 = vperm.xlu1 %753, %v28_v20   ;;  %v604_v48 = vrot.slane %v901_v33, %v904_v39  ;;  %s776_s28 = scalar_lea.vmem %s695_s4, 64  ;;  %p781_p1 = scmp.lt.s32.totalorder %s695_s4, %s695_s4 }
   0xf   :  { %564 = vperm.xlu0 %752, %v34_v21   ;;  %v159_v23 = vand.u32 4294901760, %v158_v22  ;;  %v495_v35 = vmul.f32 0.5, %v494_v34  ;;  %p777_p0 = scmp.ne.s32.totalorder %s695_s4, %s776_s28  ;;  %p782_p2 = scmp.lt.s32.totalorder %s776_s28, %s776_s28 }
  0x10   :  { %730 = vmatmul.mubr.f32.vlgmr.msra.gmra.mxu0 %v115_v4 }
  0x11   :  { %723 = vmatpush3.xpose.msra.mxu1 %v159_v23  ;;  %738 = vmatpush3.xpose.msra.mxu0 %v157_v19  ;;  %754 = vlog2.f32 %v495_v35  ;;  %p783_p3 = por %p782_p2, %p781_p1 }
  0x12   :  { %732 = vmatprep.subr.mxu1 %v799_v9  ;;  %739 = vmatprep.mubr.msk.f32.mxu0 %vm800_vm1, %v799_v9 }
  0x13   :  { %525 = vperm.xlu1 %753, %v29_v24   ;;  %569 = vperm.xlu0 %752, %v35_v25   ;;  %p784_p4 = pnand %p783_p3, %p777_p0 }
  0x14   :  { %725 = vmatmul.mubr.msk.f32.vlgmr.msra.gmra.mxu1 %vm41_vm0, %v801_v26  ;;  %740 = vmatmul.mubr.msk.f32.vlgmr.msra.gmra.mxu0 %vm41_vm0, %v801_v26 }
  0x15   :  { %733 = vmatpush3.xpose.msra.mxu1 %v79_v13  ;;  %734 = vmatprep.mubr.msk.f32.mxu1 %vm800_vm1, %v799_v9 }
  0x16   :  { %742 = vmatprep.subr.mxu1 %v799_v9 }
  0x17   :  { %530 = vperm.xlu1 %753, %v30_v27   ;;  %574 = vperm.xlu0 %752, %v36_v28  }
  0x18   :  { %735 = vmatmul.mubr.f32.vlgmr.msra.gmra.mxu1 %v116_v11 }
  0x19   :  { %743 = vmatpush3.xpose.msra.mxu1 %v79_v13  ;;  %744 = vmatprep.mubr.msk.f32.mxu1 %vm800_vm1, %v799_v9 }
  0x1b   :  { %535 = vperm.xlu1 %753, %v31_v29   ;;  %579 = vperm.xlu0 %752, %v37_v30  }
  0x1c   :  { %745 = vmatmul.mubr.msk.f32.vlgmr.msra.gmra.mxu1 %vm41_vm0, %v801_v26 }
  0x1e   :  { %v755_v38 = vpop.eup %754 }
  0x1f   :  { %589 = vperm.xlu1 %753, %v39_v31   ;;  %584 = vperm.xlu0 %752, %v38_v32   ;;  %v497_v40 = vmul.f32 0.6931472, %v755_v38 }
  0x21   :  { %v542_v41 = vrot.slane %v497_v40, %v904_v39 }
  0x7d   :  { %v511_v42 = vpop.permute.xlu1 %510  ;;  %v501_v43 = vpop.permute.xlu0 %500 }
  0x7e   :  { %v544_v44 = vmul.f32 %v542_v41, %v501_v43  ;;  %v546_v52 = vmul.f32 %v542_v41, %v511_v42 }
  0x81   :  { %v555_v45 = vpop.permute.xlu1 %554  ;;  %v506_v46 = vpop.permute.xlu0 %505 }
  0x82   :  { %v592_v47 = vadd.f32 %v555_v45, %v544_v44  ;;  %v545_v49 = vmul.f32 %v542_v41, %v506_v46 }
  0x84   :  { %v606_v53 = vsub.f32 %v592_v47, %v604_v48 }
  0x85   :  { %v516_v50 = vpop.permute.xlu1 %515 }
  0x86   :  { %v560_v51 = vpop.permute.xlu0 %559  ;;  %v614_v58 = vmul.f32 1.442695, %v606_v53  ;;  %v547_v59 = vmul.f32 %v542_v41, %v516_v50 }
  0x87   :  { %v593_v54 = vadd.f32 %v560_v51, %v545_v49 }
  0x88   :  { %756 = vpow2.f32 %v614_v58  ;;  %v658_v58 = vadd.f32 1e-06, %v901_v33 }
  0x89   :  { %v607_v55 = vsub.f32 %v593_v54, %v604_v48  ;;  %v521_v56 = vpop.permute.xlu1 %520 }
  0x8a   :  { %v565_v57 = vpop.permute.xlu0 %564  ;;  %v548_v3 = vmul.f32 %v542_v41, %v521_v56 }
  0x8b   :  { %v594_v60 = vadd.f32 %v565_v57, %v546_v52  ;;  %v616_v61 = vmul.f32 1.442695, %v607_v55 }
  0x8d   :  { %v608_v62 = vsub.f32 %v594_v60, %v604_v48  ;;  %758 = vpow2.f32 %v616_v61 }
  0x8e   :  { %v526_v63 = vpop.permute.xlu1 %525  ;;  %v570_v0 = vpop.permute.xlu0 %569 }
  0x8f   :  { %v595_v1 = vadd.f32 %v570_v0, %v547_v59  ;;  %v618_v2 = vmul.f32 1.442695, %v608_v62  ;;  %v549_v9 = vmul.f32 %v542_v41, %v526_v63 }
  0x91   :  { %v609_v4 = vsub.f32 %v595_v1, %v604_v48  ;;  %760 = vpow2.f32 %v618_v2 }
  0x92   :  { %v531_v5 = vpop.permute.xlu1 %530  ;;  %v575_v6 = vpop.permute.xlu0 %574 }
  0x93   :  { %v596_v7 = vadd.f32 %v575_v6, %v548_v3  ;;  %v620_v8 = vmul.f32 1.442695, %v609_v4  ;;  %v550_v15 = vmul.f32 %v542_v41, %v531_v5 }
  0x95   :  { %v610_v10 = vsub.f32 %v596_v7, %v604_v48  ;;  %762 = vpow2.f32 %v620_v8  ;;  %v757_v23 = vpop.eup %756 }
  0x96   :  { %v536_v11 = vpop.permute.xlu1 %535  ;;  %v580_v12 = vpop.permute.xlu0 %579  ;;  %v631_v29 = vsel %vm630_vm2, %v757_v23, 0.0 }
  0x97   :  { %v622_v13 = vmul.f32 1.442695, %v610_v10  ;;  %v597_v14 = vadd.f32 %v580_v12, %v549_v9  ;;  %v551_v16 = vmul.f32 %v542_v41, %v536_v11 }
  0x99   :  { %v611_v17 = vsub.f32 %v597_v14, %v604_v48  ;;  %764 = vpow2.f32 %v622_v13  ;;  %v656_v13 = vsub.f32 0.0, %v901_v33 }
  0x9a   :  { %v590_v18 = vpop.permute.xlu1 %589  ;;  %v585_v19 = vpop.permute.xlu0 %584 }
  0x9b   :  { %v624_v20 = vmul.f32 1.442695, %v611_v17  ;;  %v599_v21 = vadd.f32 %v590_v18, %v551_v16  ;;  %v598_v22 = vadd.f32 %v585_v19, %v550_v15  ;;  %v759_v24 = vpop.eup %758 }
  0x9c   :  { %v632_v30 = vsel %vm630_vm2, %v759_v24, 0.0 }
  0x9d   :  { %766 = vpow2.f32 %v624_v20  ;;  %v613_v25 = vsub.f32 %v599_v21, %v604_v48  ;;  %v612_v26 = vsub.f32 %v598_v22, %v604_v48  ;;  %v633_v32 = vadd.f32 %v632_v30, %v631_v29 }
  0x9e   :  { %v761_v31 = vpop.eup %760 }
  0x9f   :  { %v628_v27 = vmul.f32 1.442695, %v613_v25  ;;  %v626_v28 = vmul.f32 1.442695, %v612_v26  ;;  %v634_v34 = vsel %vm630_vm2, %v761_v31, 0.0 }
  0xa0   :  { %v635_v37 = vadd.f32 %v634_v34, %v633_v32 }
  0xa1   :  { %768 = vpow2.f32 %v628_v27 }
  0xa2   :  { %770 = vpow2.f32 %v626_v28  ;;  %v763_v35 = vpop.eup %762 }
  0xa3   :  { %v636_v38 = vsel %vm630_vm2, %v763_v35, 0.0  ;;  %772 = vlog2.f32 %v658_v58 }
  0xa4   :  { %v637_v42 = vadd.f32 %v636_v38, %v635_v37 }
  0xa6   :  { %v765_v36 = vpop.eup %764 }
  0xa7   :  { %v638_v41 = vsel %vm630_vm2, %v765_v36, 0.0 }
  0xa8   :  { %v639_v44 = vadd.f32 %v638_v41, %v637_v42 }
  0xaa   :  { %v767_v40 = vpop.eup %766 }
  0xab   :  { %v640_v43 = vsel %vm630_vm2, %v767_v40, 0.0 }
  0xac   :  { %v641_v47 = vadd.f32 %v640_v43, %v639_v44 }
  0xae   :  { %v769_v45 = vpop.eup %768 }
  0xaf   :  { %v771_v46 = vpop.eup %770  ;;  %v644_v50 = vsel %vm630_vm2, %v769_v45, 0.0 }
  0xb0   :  { %v642_v48 = vsel %vm630_vm2, %v771_v46, 0.0  ;;  %v773_v3 = vpop.eup %772 }
  0xb1   :  { %v643_v49 = vadd.f32 %v642_v48, %v641_v47  ;;  %v660_v9 = vmul.f32 0.6931472, %v773_v3 }
  0xb3   :  { %v645_v51 = vadd.f32 %v644_v50, %v643_v49  ;;  %v661_v17 = vmul.f32 -15.0, %v660_v9 }
  0xb5   :  { %v646_v52 = vrot.slane %v645_v51, 4  ;;  %v675_v23 = vrot.slane %v661_v17, %v904_v39 }
  0xb7   :  { %v647_v53 = vadd.f32 %v646_v52, %v645_v51 }
  0xb9   :  { %v648_v54 = vrot.slane %v647_v53, 2 }
  0xbb   :  { %v649_v55 = vadd.f32 %v648_v54, %v647_v53 }
  0xbd   :  { %v650_v56 = vrot.slane %v649_v55, 1 }
  0xbf   :  { %v651_v57 = vadd.f32 %v650_v56, %v649_v55 }
  0xc1   :  { %v652_v59 = vadd.f32 1e-06, %v651_v57 }
  0xc3   :  { %774 = vlog2.f32 %v652_v59 }
  0xcc   :  { %v120_v60 = vpop.f32.mrf.mxu0 }
  0xce   :  { %v721_v61 = vpop.f32.mrf.mxu0 }
  0xd0   :  { %v270_v62 = vpop.f32.mrf.mxu0  ;;  %v775_v10 = vpop.eup %774 }
  0xd1   :  { %v654_v16 = vmul.f32 0.6931472, %v775_v10 }
  0xd2   :  { %v731_v63 = vpop.f32.mrf.mxu0 }
  0xd3   :  { %v655_v20 = vadd.f32 %v654_v16, %v901_v33 }
  0xd4   :  { %v196_v0 = vpop.f32.mrf.mxu1  ;;  %v418_v1 = vpop.f32.mrf.mxu0 }
  0xd5   :  { %v197_v2 = vadd.f32 %v196_v0, %v120_v60  ;;  %v678_v26 = vrot.slane %v655_v20, 5 }
  0xd6   :  { %v726_v4 = vpop.f32.mrf.mxu1  ;;  %v741_v5 = vpop.f32.mrf.mxu0 }
  0xd7   :  { %v271_v6 = vadd.f32 %v270_v62, %v197_v2 }
  0xd8   :  { %v344_v7 = vpop.f32.mrf.mxu1 }
  0xd9   :  { %v345_v8 = vadd.f32 %v344_v7, %v271_v6 }
  0xda   :  { %v736_v11 = vpop.f32.mrf.mxu1 }
  0xdb   :  { %v419_v12 = vadd.f32 %v418_v1, %v345_v8 }
  0xdc   :  { %v490_v14 = vpop.f32.mrf.mxu1 }
  0xdd   :  { %v491_v15 = vadd.f32 %v490_v14, %v419_v12 }
  0xde   :  { %v746_v18 = vpop.f32.mrf.mxu1 }
  0xdf   :  { %v657_v19 = vmul.f32 %v656_v13, %v491_v15 }
  0xe1   :  { %v662_v21 = vadd.f32 %v661_v17, %v657_v19  ;;  %v669_v25 = vrot.slane %v657_v19, %v904_v39 }
  0xe3   :  { %v663_v22 = vadd.f32 %v662_v21, %v655_v20 }
  0xe5   :  { %v664_v24 = vadd.f32 29.406033, %v663_v22 }
  0xe7   :  { %v681_v27 = vsel %vm680_vm3, %v664_v24, %v669_v25 }
  0xe8   :  { %v683_v28 = vsel %vm682_vm4, %v681_v27, %v675_v23 }
  0xe9   :  { %v685_v29 = vsel %vm684_vm5, %v683_v28, %v678_v26 }
  0xea   :  { %687 = vst.msk [vmem:[#allocation2] sm:$0xf] %vm686_vm6, %v685_v29 }
  0xeb   :  { %787 = shalt.err (!%p784_p4)
}
  0xec   :  { %697 = dma.vmem_to_hbm [thread:$0]  %s695_s4, 64, %s930_s5, [#allocation3]  }
  0xed   :  { %796 = dma.done.wait [#allocation3], 64  }
  0xee   :  { %797 = vsyncadd [#allocation3], 4294967232 }
  0xef   :  { %701 = vsyncpa [#allocation3], 1 }

</bundles_post_ra>
